<compile_context>
chip_gen: v6e
topology: v6e:2x2x1
jax: 0.10.0
libtpu: 0.0.40
codegen_flags: <defaults>
</compile_context>

<pallas_src>
import jax
import jax.numpy as jnp
from jax.experimental import pallas as pl
from jax.experimental.pallas import tpu as pltpu

EPS = 1e-5


# ----------------------------- kernels ------------------------------------- #

def _valid_row_mask(n_valid_ref, tm):
    # (tm, 1) mask: True for rows that belong to the real (unpadded) batch.
    row_ids = pl.program_id(0) * tm + jax.lax.broadcasted_iota(
        jnp.int32, (tm, 1), 0)
    return row_ids < n_valid_ref[0]


def linear_stats_kernel(n_valid_ref, x_ref, w_ref, b_ref,
                        h_ref, sum_ref, sumsq_ref):
    """h = x @ w + b for one row tile; also emits this tile's per-feature sum and
    sum-of-squares (over valid rows only) so full-batch BN stats can be
    finalized in the wrapper."""
    tm = x_ref.shape[0]
    h = jnp.dot(x_ref[...], w_ref[...],
                preferred_element_type=jnp.float32) + b_ref[...]
    h_ref[...] = h

    hm = jnp.where(_valid_row_mask(n_valid_ref, tm), h, 0.0)
    s = jnp.sum(hm, axis=0, keepdims=True)
    ss = jnp.sum(hm * hm, axis=0, keepdims=True)
    # Partial sums are written as an 8-row (sublane-aligned) block per tile.
    sum_ref[...] = jnp.broadcast_to(s, sum_ref.shape)
    sumsq_ref[...] = jnp.broadcast_to(ss, sumsq_ref.shape)


def bn_prelu_linear_stats_kernel(n_valid_ref, h_ref, scale_ref, shift_ref,
                                 alpha_ref, w_ref, b_ref,
                                 out_ref, sum_ref, sumsq_ref):
    """a = PReLU(h*scale + shift); out = a @ w + b; plus per-tile stats of out."""
    tm = h_ref.shape[0]
    a = h_ref[...] * scale_ref[...] + shift_ref[...]     # fused BN affine
    alpha = alpha_ref[0, 0]                               # SMEM scalar
    a = jnp.where(a >= 0, a, alpha * a)
    o = jnp.dot(a, w_ref[...],
                preferred_element_type=jnp.float32) + b_ref[...]
    out_ref[...] = o

    om = jnp.where(_valid_row_mask(n_valid_ref, tm), o, 0.0)
    s = jnp.sum(om, axis=0, keepdims=True)
    ss = jnp.sum(om * om, axis=0, keepdims=True)
    sum_ref[...] = jnp.broadcast_to(s, sum_ref.shape)
    sumsq_ref[...] = jnp.broadcast_to(ss, sumsq_ref.shape)


def bn_prelu_linear_kernel(h_ref, scale_ref, shift_ref, alpha_ref,
                           w_ref, b_ref, out_ref):
    a = h_ref[...] * scale_ref[...] + shift_ref[...]
    alpha = alpha_ref[0, 0]
    a = jnp.where(a >= 0, a, alpha * a)
    out_ref[...] = jnp.dot(a, w_ref[...],
                           preferred_element_type=jnp.float32) + b_ref[...]


# ----------------------------- wrapper -------------------------------------- #

def _round_up(x, m):
    return ((x + m - 1) // m) * m


def _finalize_bn(sum_rows, sumsq_rows, n, gamma, beta):
    """sum/sumsq rows: (n_tiles*8, F), each tile's partial broadcast over 8 rows.
    Returns (scale, shift) so BN becomes h*scale + shift inside the next kernel."""
    s = jnp.sum(sum_rows[::8], axis=0, keepdims=True)
    ss = jnp.sum(sumsq_rows[::8], axis=0, keepdims=True)
    mean = s / n
    var = jnp.maximum(ss / n - mean * mean, 0.0)   # biased variance (torch train mode)
    scale = gamma * jax.lax.rsqrt(var + EPS)
    shift = beta - mean * scale
    return scale, shift


def _call_opts(flops, bytes_accessed):
    return dict(
        compiler_params=pltpu.CompilerParams(
            dimension_semantics=("parallel",),
            vmem_limit_bytes=32 * 1024 * 1024,
        ),
        cost_estimate=pl.CostEstimate(
            flops=int(flops), transcendentals=0,
            bytes_accessed=int(bytes_accessed)),
    )


def fully_connected_app(x, params, *, tile_rows=512):
    n, in_dim = x.shape
    h1_dim = params["w1"].shape[1]
    h2_dim = params["w2"].shape[1]
    out_dim = params["w3"].shape[1]

    # Row tile: multiple of 8 sublanes, capped at tile_rows.
    tm = min(tile_rows, _round_up(n, 8))
    n_pad = _round_up(n, tm)
    n_tiles = n_pad // tm
    x_p = x if n_pad == n else jnp.pad(x, ((0, n_pad - n), (0, 0)))
    n_valid = jnp.array([n], jnp.int32)

    smem_spec = pl.BlockSpec(memory_space=pltpu.MemorySpace.SMEM)

    # ---- pass 1: h1 = X @ W1 + b1 (+ stats of h1) ----
    h1, s1, ss1 = pl.pallas_call(
        linear_stats_kernel,
        grid_spec=pltpu.PrefetchScalarGridSpec(
            num_scalar_prefetch=1,
            grid=(n_tiles,),
            in_specs=[
                pl.BlockSpec((tm, in_dim), lambda i, nv: (i, 0)),
                pl.BlockSpec((in_dim, h1_dim), lambda i, nv: (0, 0)),
                pl.BlockSpec((1, h1_dim), lambda i, nv: (0, 0)),
            ],
            out_specs=[
                pl.BlockSpec((tm, h1_dim), lambda i, nv: (i, 0)),
                pl.BlockSpec((8, h1_dim), lambda i, nv: (i, 0)),
                pl.BlockSpec((8, h1_dim), lambda i, nv: (i, 0)),
            ],
        ),
        out_shape=(
            jax.ShapeDtypeStruct((n_pad, h1_dim), jnp.float32),
            jax.ShapeDtypeStruct((n_tiles * 8, h1_dim), jnp.float32),
            jax.ShapeDtypeStruct((n_tiles * 8, h1_dim), jnp.float32),
        ),
        **_call_opts(2 * n_pad * in_dim * h1_dim,
                     4 * (n_pad * in_dim + in_dim * h1_dim + n_pad * h1_dim)),
    )(n_valid, x_p, params["w1"], params["b1"])
    scale1, shift1 = _finalize_bn(s1, ss1, n, params["g1"], params["be1"])

    # ---- pass 2: a1 = PReLU(BN(h1)); h2 = a1 @ W2 + b2 (+ stats of h2) ----
    h2, s2, ss2 = pl.pallas_call(
        bn_prelu_linear_stats_kernel,
        grid_spec=pltpu.PrefetchScalarGridSpec(
            num_scalar_prefetch=1,
            grid=(n_tiles,),
            in_specs=[
                pl.BlockSpec((tm, h1_dim), lambda i, nv: (i, 0)),
                pl.BlockSpec((1, h1_dim), lambda i, nv: (0, 0)),
                pl.BlockSpec((1, h1_dim), lambda i, nv: (0, 0)),
                smem_spec,                                    # alpha1 scalar
                pl.BlockSpec((h1_dim, h2_dim), lambda i, nv: (0, 0)),
                pl.BlockSpec((1, h2_dim), lambda i, nv: (0, 0)),
            ],
            out_specs=[
                pl.BlockSpec((tm, h2_dim), lambda i, nv: (i, 0)),
                pl.BlockSpec((8, h2_dim), lambda i, nv: (i, 0)),
                pl.BlockSpec((8, h2_dim), lambda i, nv: (i, 0)),
            ],
        ),
        out_shape=(
            jax.ShapeDtypeStruct((n_pad, h2_dim), jnp.float32),
            jax.ShapeDtypeStruct((n_tiles * 8, h2_dim), jnp.float32),
            jax.ShapeDtypeStruct((n_tiles * 8, h2_dim), jnp.float32),
        ),
        **_call_opts(2 * n_pad * h1_dim * h2_dim,
                     4 * (n_pad * h1_dim + h1_dim * h2_dim + n_pad * h2_dim)),
    )(n_valid, h1, scale1, shift1, params["a1"], params["w2"], params["b2"])
    scale2, shift2 = _finalize_bn(s2, ss2, n, params["g2"], params["be2"])

    # ---- pass 3: a2 = PReLU(BN(h2)); y = a2 @ W3 + b3 ----
    y = pl.pallas_call(
        bn_prelu_linear_kernel,
        grid_spec=pltpu.PrefetchScalarGridSpec(
            num_scalar_prefetch=0,
            grid=(n_tiles,),
            in_specs=[
                pl.BlockSpec((tm, h2_dim), lambda i: (i, 0)),
                pl.BlockSpec((1, h2_dim), lambda i: (0, 0)),
                pl.BlockSpec((1, h2_dim), lambda i: (0, 0)),
                smem_spec,                                    # alpha2 scalar
                pl.BlockSpec((h2_dim, out_dim), lambda i: (0, 0)),
                pl.BlockSpec((1, out_dim), lambda i: (0, 0)),
            ],
            out_specs=pl.BlockSpec((tm, out_dim), lambda i: (i, 0)),
        ),
        out_shape=jax.ShapeDtypeStruct((n_pad, out_dim), jnp.float32),
        **_call_opts(2 * n_pad * h2_dim * out_dim,
                     4 * (n_pad * h2_dim + h2_dim * out_dim + n_pad * out_dim)),
    )(h2, scale2, shift2, params["a2"], params["w3"], params["b3"])

    y = y[:n]
    # torch.cat((X, y), dim=1) in the wrapper: keeps every kernel's output
    # lane-dense instead of a 48-wide split-at-lane-32 masked store.
    return jnp.concatenate([x, y], axis=1)


# ----------------------------- init / reference ----------------------------- #

def init_params(key, in_dim, hid_dim1, hid_dim2, out_dim):
    """Deterministic init mimicking torch defaults (U(-1/sqrt(fan_in), +...))."""
    ks = jax.random.split(key, 6)

    def lin(kw, kb, fan_in, fan_out):
        bound = 1.0 / jnp.sqrt(float(fan_in))
        w = jax.random.uniform(kw, (fan_in, fan_out), jnp.float32, -bound, bound)
        b = jax.random.uniform(kb, (1, fan_out), jnp.float32, -bound, bound)
        return w, b

    w1, b1 = lin(ks[0], ks[1], in_dim, hid_dim1)
    w2, b2 = lin(ks[2], ks[3], hid_dim1, hid_dim2)
    w3, b3 = lin(ks[4], ks[5], hid_dim2, out_dim)
    return dict(
        w1=w1, b1=b1, g1=jnp.ones((1, hid_dim1), jnp.float32),
        be1=jnp.zeros((1, hid_dim1), jnp.float32),
        a1=jnp.full((1, 1), 0.25, jnp.float32),
        w2=w2, b2=b2, g2=jnp.ones((1, hid_dim2), jnp.float32),
        be2=jnp.zeros((1, hid_dim2), jnp.float32),
        a2=jnp.full((1, 1), 0.25, jnp.float32),
        w3=w3, b3=b3,
    )


def _reference(x, p):
    """Plain-JAX reference of the same forward pass (training-mode BatchNorm1d)."""
    def bn(h, g, b):
        mean = jnp.mean(h, axis=0, keepdims=True)
        var = jnp.mean((h - mean) ** 2, axis=0, keepdims=True)
        return g * (h - mean) * jax.lax.rsqrt(var + EPS) + b

    def prelu(h, a):
        return jnp.where(h >= 0, h, a * h)

    h = x @ p["w1"] + p["b1"]
    h = prelu(bn(h, p["g1"], p["be1"]), p["a1"][0, 0])
    h = h @ p["w2"] + p["b2"]
    h = prelu(bn(h, p["g2"], p["be2"]), p["a2"][0, 0])
    h = h @ p["w3"] + p["b3"]
    return jnp.concatenate([x, h], axis=1)


if __name__ == "__main__":
    in_dim, hid_dim1, hid_dim2, out_dim = 32, 64, 64, 16

    key = jax.random.PRNGKey(0)
    kx, kp, kx2 = jax.random.split(key, 3)
    params = init_params(kp, in_dim, hid_dim1, hid_dim2, out_dim)

    # 1) Single-tile case (whole batch in one row tile).
    batch = 8
    x = jax.random.normal(kx, (batch, in_dim), jnp.float32)
    out = jax.block_until_ready(fully_connected_app(x, params))
    ref = _reference(x, params)
    assert out.shape == (batch, in_dim + out_dim)
    assert jnp.allclose(out, ref, atol=1e-4, rtol=1e-4)

    # 2) Multi-tile case with row padding (exercises the tiled/masked-stats path).
    batch2 = 20
    x2 = jax.random.normal(kx2, (batch2, in_dim), jnp.float32)
    out2 = jax.block_until_ready(fully_connected_app(x2, params, tile_rows=8))
    ref2 = _reference(x2, params)
    assert out2.shape == (batch2, in_dim + out_dim)
    assert jnp.allclose(out2, ref2, atol=1e-4, rtol=1e-4)

    print("KERNEL_OK")
</pallas_src>

<mosaic_0001>
module attributes {stable_mosaic.version = 11 : i64} {
  func.func @linear_stats_kernel(%arg0: i32, %arg1: memref<1xi32, #tpu.memory_space<smem>>, %arg2: memref<8x32xf32, #tpu.memory_space<vmem>>, %arg3: memref<32x64xf32, #tpu.memory_space<vmem>>, %arg4: memref<1x64xf32, #tpu.memory_space<vmem>>, %arg5: memref<8x64xf32, #tpu.memory_space<vmem>>, %arg6: memref<8x64xf32, #tpu.memory_space<vmem>>, %arg7: memref<8x64xf32, #tpu.memory_space<vmem>>) attributes {dimension_semantics = [#tpu.dimension_semantics<parallel>], iteration_bounds = array<i64: 1>, scalar_prefetch = 1 : i64, scratch_operands = 0 : i64, tpu.core_type = #tpu.core_type<tc>, window_params = [{transform_indices = @transform_0, window_bounds = array<i64: 8, 32>}, {pipeline_mode = #tpu.pipeline_mode<synchronous>, transform_indices = @transform_1, window_bounds = array<i64: 32, 64>}, {pipeline_mode = #tpu.pipeline_mode<synchronous>, transform_indices = @transform_2, window_bounds = array<i64: 1, 64>}, {transform_indices = @transform_3, window_bounds = array<i64: 8, 64>}, {transform_indices = @transform_4, window_bounds = array<i64: 8, 64>}, {transform_indices = @transform_5, window_bounds = array<i64: 8, 64>}]} {
    %c0 = arith.constant 0 : index
    %c0_0 = arith.constant 0 : index
    %0 = vector.load %arg2[%c0, %c0_0] : memref<8x32xf32, #tpu.memory_space<vmem>>, vector<8x32xf32>
    %c0_1 = arith.constant 0 : index
    %c0_2 = arith.constant 0 : index
    %1 = vector.load %arg3[%c0_1, %c0_2] : memref<32x64xf32, #tpu.memory_space<vmem>>, vector<32x64xf32>
    %cst = arith.constant dense<0.000000e+00> : vector<8x64xf32>
    %2 = tpu.matmul %0, %1, %cst {dimension_numbers = #tpu.dot_dimension_numbers<[1], [0], [0], [1], [0, 0, 1, 1], [], []>} : vector<8x32xf32>, vector<32x64xf32>, vector<8x64xf32> -> vector<8x64xf32>
    %c0_3 = arith.constant 0 : index
    %c0_4 = arith.constant 0 : index
    %3 = vector.load %arg4[%c0_3, %c0_4] : memref<1x64xf32, #tpu.memory_space<vmem>>, vector<1x64xf32>
    %4 = vector.broadcast %3 : vector<1x64xf32> to vector<8x64xf32>
    %5 = arith.addf %2, %4 : vector<8x64xf32>
    %c0_5 = arith.constant 0 : index
    %c0_6 = arith.constant 0 : index
    %6 = vector.load %arg5[%c0_5, %c0_6] : memref<8x64xf32, #tpu.memory_space<vmem>>, vector<8x64xf32>
    tpu.vector_store %arg5[%c0_5, %c0_6], %5 {strides = array<i32>} : memref<8x64xf32, #tpu.memory_space<vmem>>, vector<8x64xf32>,
    %c8_i32 = arith.constant 8 : i32
    %7 = arith.muli %arg0, %c8_i32 : i32
    %8 = tpu.iota {dimensions = array<i32: 0>} : vector<8x1xi32>
    %9 = vector.broadcast %7 : i32 to vector<8x1xi32>
    %10 = arith.addi %9, %8 : vector<8x1xi32>
    %c0_7 = arith.constant 0 : index
    %11 = memref.load %arg1[%c0_7] : memref<1xi32, #tpu.memory_space<smem>>
    %12 = vector.broadcast %11 : i32 to vector<8x1xi32>
    %13 = arith.cmpi slt, %10, %12 : vector<8x1xi32>
    %cst_8 = arith.constant 0.000000e+00 : f32
    %14 = vector.shape_cast %13 : vector<8x1xi1> to vector<8x1xi1>
    %15 = vector.broadcast %14 : vector<8x1xi1> to vector<8x64xi1>
    %16 = vector.broadcast %cst_8 : f32 to vector<8x64xf32>
    %17 = arith.select %15, %5, %16 : vector<8x64xi1>, vector<8x64xf32>
    %cst_9 = arith.constant dense<0.000000e+00> : vector<64xf32>
    %18 = vector.multi_reduction <add>, %17, %cst_9 [0] : vector<8x64xf32> to vector<64xf32>
    %19 = vector.shape_cast %18 : vector<64xf32> to vector<1x64xf32>
    %20 = arith.mulf %17, %17 : vector<8x64xf32>
    %cst_10 = arith.constant dense<0.000000e+00> : vector<64xf32>
    %21 = vector.multi_reduction <add>, %20, %cst_10 [0] : vector<8x64xf32> to vector<64xf32>
    %22 = vector.shape_cast %21 : vector<64xf32> to vector<1x64xf32>
    %23 = vector.shape_cast %19 : vector<1x64xf32> to vector<1x64xf32>
    %24 = vector.broadcast %23 : vector<1x64xf32> to vector<8x64xf32>
    %c0_11 = arith.constant 0 : index
    %c0_12 = arith.constant 0 : index
    %25 = vector.load %arg6[%c0_11, %c0_12] : memref<8x64xf32, #tpu.memory_space<vmem>>, vector<8x64xf32>
    tpu.vector_store %arg6[%c0_11, %c0_12], %24 {strides = array<i32>} : memref<8x64xf32, #tpu.memory_space<vmem>>, vector<8x64xf32>,
    %26 = vector.shape_cast %22 : vector<1x64xf32> to vector<1x64xf32>
    %27 = vector.broadcast %26 : vector<1x64xf32> to vector<8x64xf32>
    %c0_13 = arith.constant 0 : index
    %c0_14 = arith.constant 0 : index
    %28 = vector.load %arg7[%c0_13, %c0_14] : memref<8x64xf32, #tpu.memory_space<vmem>>, vector<8x64xf32>
    tpu.vector_store %arg7[%c0_13, %c0_14], %27 {strides = array<i32>} : memref<8x64xf32, #tpu.memory_space<vmem>>, vector<8x64xf32>,
    return
  }
  func.func @transform_0(%arg0: i32, %arg1: memref<1xi32, #tpu.memory_space<smem>>) -> (i32, i32) {
    %c0_i32 = arith.constant 0 : i32
    %c0_i32_0 = arith.constant 0 : i32
    return %arg0, %c0_i32 : i32, i32
  }
  func.func @transform_1(%arg0: i32, %arg1: memref<1xi32, #tpu.memory_space<smem>>) -> (i32, i32) {
    %c0_i32 = arith.constant 0 : i32
    %c0_i32_0 = arith.constant 0 : i32
    %c0_i32_1 = arith.constant 0 : i32
    return %c0_i32, %c0_i32_0 : i32, i32
  }
  func.func @transform_2(%arg0: i32, %arg1: memref<1xi32, #tpu.memory_space<smem>>) -> (i32, i32) {
    %c0_i32 = arith.constant 0 : i32
    %c0_i32_0 = arith.constant 0 : i32
    %c0_i32_1 = arith.constant 0 : i32
    return %c0_i32, %c0_i32_0 : i32, i32
  }
  func.func @transform_3(%arg0: i32, %arg1: memref<1xi32, #tpu.memory_space<smem>>) -> (i32, i32) {
    %c0_i32 = arith.constant 0 : i32
    %c0_i32_0 = arith.constant 0 : i32
    return %arg0, %c0_i32 : i32, i32
  }
  func.func @transform_4(%arg0: i32, %arg1: memref<1xi32, #tpu.memory_space<smem>>) -> (i32, i32) {
    %c0_i32 = arith.constant 0 : i32
    %c0_i32_0 = arith.constant 0 : i32
    return %arg0, %c0_i32 : i32, i32
  }
  func.func @transform_5(%arg0: i32, %arg1: memref<1xi32, #tpu.memory_space<smem>>) -> (i32, i32) {
    %c0_i32 = arith.constant 0 : i32
    %c0_i32_0 = arith.constant 0 : i32
    return %arg0, %c0_i32 : i32, i32
  }
}

</mosaic_0001>

<bundles_post_ra>
// kernel: tpu_custom_call.1
= control target key start
LH: loop header
LB: loop body
LE: loop exit
PB: predicated region body
PF: predicated region fallthrough
CT: control target
= control target key end

     0   :  { %13 = vsyncpa [#allocation5], 0  ;;  %s411_s0 = inlined_call_operand.<no memory space> [shape: s32[1], index: 0, kind: input, shape index: {}]   ;;  %s412_s1 = inlined_call_operand.hbm [shape: f32[8,32], index: 1, kind: input, shape index: {}]   ;;  %s413_s2 = inlined_call_operand.hbm [shape: f32[32,64], index: 2, kind: input, shape index: {}]   ;;  %s414_s3 = inlined_call_operand.vmem [shape: f32[1,64], index: 3, kind: input, shape index: {}]   ;;  %s415_s4 = inlined_call_operand.hbm [shape: f32[8,64], index: 4, kind: output, shape index: {0}]   ;;  %s416_s5 = inlined_call_operand.hbm [shape: f32[8,64], index: 5, kind: output, shape index: {1}]   ;;  %s417_s6 = inlined_call_operand.hbm [shape: f32[8,64], index: 6, kind: output, shape index: {2}]  }
   0x1   :  { %14 = vsyncpa [#allocation8], 0 }
   0x2   :  { %15 = vsyncpa [#allocation6], 0 }
   0x3   :  { %16 = vsyncpa [#allocation11], 0  ;;  %s341_s21 = smov [#allocation4]   ;;  %s342_s23 = smov [#allocation7]  }
   0x4   :  { %s23_s22 = sshll.u32 %s341_s21, 4  ;;  %s32_s24 = sshll.u32 %s342_s23, 4  ;;  %s24_s22 = int_to_ptr.vmem [resolvable:$true] %s23_s22  ;;  %s33_s24 = int_to_ptr.vmem [resolvable:$true] %s32_s24 }
   0x5   :  { %s241_s25 = scalar_lea.vmem %s24_s22, 128  ;;  %p246_p1 = scmp.lt.s32.totalorder %s24_s22, %s24_s22 }
   0x6   :  { %p242_p0 = scmp.ne.s32.totalorder %s24_s22, %s241_s25  ;;  %p247_p2 = scmp.lt.s32.totalorder %s241_s25, %s241_s25 }
   0x8   :  { %p248_p3 = por %p247_p2, %p246_p1 }
   0xa   :  { %p249_p4 = pnand %p248_p3, %p242_p0 }
   0xc   :  { %252 = shalt.err (!%p249_p4)
}
   0xd   :  { %26 = dma.hbm_to_vmem [thread:$0]  %s412_s1, 128, %s24_s22, [#allocation5]  }
   0xe   :  { %s261_s28 = scalar_lea.vmem %s33_s24, 512  ;;  %p266_p6 = scmp.lt.s32.totalorder %s33_s24, %s33_s24 }
   0xf   :  { %p262_p5 = scmp.ne.s32.totalorder %s33_s24, %s261_s28  ;;  %p267_p7 = scmp.lt.s32.totalorder %s261_s28, %s261_s28 }
  0x11   :  { %p268_p8 = por %p267_p7, %p266_p6 }
  0x13   :  { %p269_p9 = pnand %p268_p8, %p262_p5 }
  0x15   :  { %272 = shalt.err (!%p269_p9)
}
  0x16   :  { %s343_s29 = smov 128   ;;  %s344_s30 = smov 8  }
  0x17   :  { %38 = dma.hbm_to_vmem [thread:$0]  %s413_s2, 512, %s33_s24, [#allocation8], %s343_s29, %s343_s29, %s344_s30  }
  0x18   :  { %333 = dma.done.wait [#allocation5], 128  }
  0x19   :  { %334 = vsyncadd [#allocation5], 4294967168 }
  0x1a   :  { %335 = dma.done.wait [#allocation8], 512  }
  0x1b   :  { %336 = vsyncadd [#allocation8], 4294966784  ;;  %v345_v0 = vmov 0.0   ;;  %vm346_vm0 = vmmov 0   ;;  %v51_v1 = vld [vmem:[#allocation7 + $0x18] sm:$0xff]  ;;  %v50_v2 = vld [vmem:[#allocation7 + $0x10] sm:$0xff]  ;;  %v136_v6 = vlaneseq  ;;  %v141_v8 = vstv %s411_s0 }
  0x1c   :  { %213 = vmatprep.subr.mxu0 %v345_v0  ;;  %221 = vmatprep.mubr.msk.f32.mxu0 %vm346_vm0, %v345_v0  ;;  %v49_v3 = vld [vmem:[#allocation7 + $0x8] sm:$0xff]  ;;  %v48_v4 = vld [vmem:[#allocation7] sm:$0xff]  ;;  %v47_v5 = vld [vmem:[#allocation4] sm:$0xff]  ;;  %vm59_vm1 = vcmask 261120   ;;  %s347_s11 = smov [#allocation9]   ;;  %vm133_vm2 = vcmask 523264  }
  0x1d   :  { %214 = vmatpush3.msra.mxu0 %v51_v1  ;;  %v137_v7 = vshrl.u32 %v136_v6, 7  ;;  %v206_v9 = vld [vmem:[%s414_s3] ss:$0 sm:$0xff]  ;;  %s169_s12 = sshll.u32 %s347_s11, 4  ;;  %s170_s12 = int_to_ptr.vmem [resolvable:$true] %s169_s12 }
  0x1e   :  { %215 = vmatprep.subr.mxu0 %v345_v0  ;;  %s273_s13 = scalar_lea.vmem %s170_s12, 128  ;;  %p278_p11 = scmp.lt.s32.totalorder %s170_s12, %s170_s12 }
  0x1f   :  { %216 = vmatpush3.msra.mxu0 %v50_v2  ;;  %vm142_vm3 = vcmp.lt.s32.totalorder %v137_v7, %v141_v8  ;;  %p274_p10 = scmp.ne.s32.totalorder %s170_s12, %s273_s13  ;;  %p279_p12 = scmp.lt.s32.totalorder %s273_s13, %s273_s13 }
  0x20   :  { %217 = vmatprep.subr.mxu0 %v345_v0 }
  0x21   :  { %218 = vmatpush3.msra.mxu0 %v49_v3  ;;  %p280_p13 = por %p279_p12, %p278_p11 }
  0x22   :  { %219 = vmatprep.subr.mxu0 %v345_v0 }
  0x23   :  { %220 = vmatpush3.msra.mxu0 %v48_v4  ;;  %p281_p0 = pnand %p280_p13, %p274_p10 }
  0x24   :  { %222 = vmatmul.mubr.msk.f32.vlgmr.msra.gmra.mxu0 %vm59_vm1, %v47_v5 }
  0xe4   :  { %v129_v10 = vpop.f32.mrf.mxu0 }
  0xe5   :  { %v130_v11 = vadd.f32 %v206_v9, %v129_v10 }
  0xe6   :  { %v223_v12 = vpop.f32.mrf.mxu0 }
  0xe7   :  { %v145_v13 = vsel %vm142_vm3, %v130_v11, 0.0  ;;  %134 = vst.msk [vmem:[#allocation9] sm:$0xff] %vm133_vm2, %v130_v11 }
  0xe8   :  { %v146_v14 = vsel %vm133_vm2, %v145_v13, 0.0  ;;  %v153_v15 = vmul.f32 %v145_v13, %v145_v13 }
  0xe9   :  { %284 = shalt.err (!%p281_p0)
}
  0xea   :  { %172 = dma.vmem_to_hbm [thread:$0]  %s170_s12, 128, %s415_s4, [#allocation6]   ;;  %v147_v16 = vrot.slane %v146_v14, 4  ;;  %v154_v17 = vsel %vm133_vm2, %v153_v15, 0.0 }
  0xeb   :  { %v155_v19 = vrot.slane %v154_v17, 4  ;;  %s348_s14 = smov [#allocation10]   ;;  %s349_s16 = smov [#allocation12]  }
  0xec   :  { %v148_v18 = vadd.f32 %v147_v16, %v146_v14  ;;  %s179_s15 = sshll.u32 %s348_s14, 4  ;;  %s189_s17 = sshll.u32 %s349_s16, 4  ;;  %s180_s15 = int_to_ptr.vmem [resolvable:$true] %s179_s15  ;;  %s190_s17 = int_to_ptr.vmem [resolvable:$true] %s189_s17 }
  0xed   :  { %v156_v21 = vadd.f32 %v155_v19, %v154_v17  ;;  %s293_s4 = scalar_lea.vmem %s180_s15, 128  ;;  %p298_p2 = scmp.lt.s32.totalorder %s180_s15, %s180_s15 }
  0xee   :  { %v149_v20 = vrot.slane %v148_v18, 2  ;;  %p294_p1 = scmp.ne.s32.totalorder %s180_s15, %s293_s4  ;;  %p299_p3 = scmp.lt.s32.totalorder %s293_s4, %s293_s4 }
  0xef   :  { %v157_v23 = vrot.slane %v156_v21, 2 }
  0xf0   :  { %v150_v22 = vadd.f32 %v149_v20, %v148_v18  ;;  %p300_p4 = por %p299_p3, %p298_p2 }
  0xf1   :  { %v158_v24 = vadd.f32 %v157_v23, %v156_v21 }
  0xf2   :  { %v151_v25 = vrot.slane %v150_v22, 1  ;;  %p301_p5 = pnand %p300_p4, %p294_p1 }
  0xf3   :  { %v159_v27 = vrot.slane %v158_v24, 1 }
  0xf4   :  { %v152_v26 = vadd.f32 %v151_v25, %v150_v22 }
  0xf5   :  { %v160_v28 = vadd.f32 %v159_v27, %v158_v24 }
  0xf6   :  { %161 = vst.msk [vmem:[#allocation10] sm:$0xff] %vm133_vm2, %v152_v26 }
  0xf7   :  { %304 = shalt.err (!%p301_p5)
}
  0xf8   :  { %182 = dma.vmem_to_hbm [thread:$0]  %s180_s15, 128, %s416_s5, [#allocation11]   ;;  %162 = vst.msk [vmem:[#allocation12] sm:$0xff] %vm133_vm2, %v160_v28 }
  0xf9   :  { %s313_s20 = scalar_lea.vmem %s190_s17, 128  ;;  %p318_p7 = scmp.lt.s32.totalorder %s190_s17, %s190_s17 }
  0xfa   :  { %p314_p6 = scmp.ne.s32.totalorder %s190_s17, %s313_s20  ;;  %p319_p8 = scmp.lt.s32.totalorder %s313_s20, %s313_s20 }
  0xfc   :  { %p320_p9 = por %p319_p8, %p318_p7 }
  0xfe   :  { %p321_p10 = pnand %p320_p9, %p314_p6 }
 0x100   :  { %324 = shalt.err (!%p321_p10)
}
 0x101   :  { %192 = dma.vmem_to_hbm [thread:$0]  %s190_s17, 128, %s417_s6, [#allocation11]  }
 0x102   :  { %337 = dma.done.wait [#allocation6], 128  }
 0x103   :  { %338 = vsyncadd [#allocation6], 4294967168 }
 0x104   :  { %339 = dma.done.wait [#allocation11], 256  }
 0x105   :  { %340 = vsyncadd [#allocation11], 4294967040 }
 0x106   :  { %202 = vsyncpa [#allocation5], 1 }
 0x107   :  { %203 = vsyncpa [#allocation8], 1 }
 0x108   :  { %204 = vsyncpa [#allocation6], 1 }
 0x109   :  { %205 = vsyncpa [#allocation11], 1 }

</bundles_post_ra>
